<compile_context>
chip_gen: v5e
topology: v5e:2x2
jax: 0.10.0
libtpu: 0.0.40
codegen_flags: <defaults>
</compile_context>

<pallas_src>
import jax
import jax.numpy as jnp
from jax.experimental import pallas as pl
from jax.experimental.pallas import tpu as pltpu

LANE = 128      # TPU lane width
SUBLANE = 8     # TPU sublane group


def _round_up(x, m):
    return ((x + m - 1) // m) * m


def _make_kernel(f_pad, width):
    """Build the fused kernel with static row offsets into the parameter blob.

    Blob row layout (all rows are `width` lanes, offsets 8-row aligned):
      [0,            f_pad)           : W1   (f_pad, width)
      [f_pad,        f_pad+8)         : b1 in the first row, rest zero
      [f_pad+8,      f_pad+8+width)   : W2   (width, width)
      [f_pad+8+width,f_pad+16+width)  : b2 in the first row, rest zero
    """
    r_b1 = f_pad
    r_w2 = f_pad + SUBLANE
    r_b2 = f_pad + SUBLANE + width

    def kernel(x_ref, p_ref, y_ref):
        x = x_ref[...]                               # (B_pad, f_pad)
        w1 = p_ref[0:f_pad, :]                       # (f_pad, width)
        b1 = p_ref[r_b1:r_b1 + 1, :]                 # (1, width)
        w2 = p_ref[r_w2:r_w2 + width, :]             # (width, width)
        b2 = p_ref[r_b2:r_b2 + 1, :]                 # (1, width)

        h = jnp.dot(x, w1, preferred_element_type=jnp.float32) + b1
        h = jnp.maximum(h, 0.0)                      # (B_pad, width)
        y_ref[...] = (jnp.dot(h, w2, preferred_element_type=jnp.float32) + b2)

    return kernel


def pack_params(params, n_feature):
    """One-time packing of the 8 PyTorch-style tensors into a single blob.

    params: (w11, b11, w12, b12, w21, b21, w22, b22), weights stored as
            (in_features, out_features), biases as (1, out_features).
    Returns (blob, static_dims).
    """
    w11, b11, w12, b12, w21, b21, w22, b22 = params
    hidden = w11.shape[1]
    outsigma = w12.shape[1]
    n_stock = w22.shape[1]
    out_total = outsigma + n_stock

    # Single padded width for hidden AND output (both lane-dense, >= 128).
    width = max(LANE, _round_up(2 * hidden, LANE), _round_up(out_total, LANE))
    f_pad = _round_up(n_feature, SUBLANE)

    total_rows = f_pad + SUBLANE + width + SUBLANE
    blob = jnp.zeros((total_rows, width), jnp.float32)

    # Layer 1: [w11 | w21] in the first 2*hidden columns; padded cols/rows zero.
    blob = blob.at[:n_feature, :hidden].set(w11)
    blob = blob.at[:n_feature, hidden:2 * hidden].set(w21)
    r_b1 = f_pad
    blob = blob.at[r_b1, :hidden].set(b11[0])
    blob = blob.at[r_b1, hidden:2 * hidden].set(b21[0])   # padded b1 stays 0

    # Layer 2: block-diagonal weight; padded rows/cols zero.
    r_w2 = f_pad + SUBLANE
    blob = blob.at[r_w2:r_w2 + hidden, :outsigma].set(w12)
    blob = blob.at[r_w2 + hidden:r_w2 + 2 * hidden,
                   outsigma:out_total].set(w22)
    r_b2 = r_w2 + width
    blob = blob.at[r_b2, :outsigma].set(b12[0])
    blob = blob.at[r_b2, outsigma:out_total].set(b22[0])  # padded b2 stays 0

    return blob, (outsigma, n_stock, f_pad, width)


def regression_layer_forward(x, blob, dims):
    """x: (batch, n_feature) float32.  Returns (y1, y2) matching PyTorch:
       y1: (batch, outsigma, 1), y2: (batch, n_stock, 1)."""
    outsigma, n_stock, f_pad, width = dims
    B, F = x.shape
    B_pad = _round_up(B, SUBLANE)

    # Pad batch to a sublane multiple and features to f_pad (zeros are inert
    # because the corresponding W1 rows are zero).
    x_pad = jnp.zeros((B_pad, f_pad), jnp.float32).at[:B, :F].set(x)

    kernel = _make_kernel(f_pad, width)
    vmem = pl.BlockSpec(memory_space=pltpu.MemorySpace.VMEM)

    cost = pl.CostEstimate(
        flops=2 * B_pad * f_pad * width + 2 * B_pad * width * width,
        transcendentals=0,
        bytes_accessed=(x_pad.size + blob.size + B_pad * width) * 4,
    )

    y = pl.pallas_call(
        kernel,
        out_shape=jax.ShapeDtypeStruct((B_pad, width), jnp.float32),
        in_specs=[vmem, vmem],
        out_specs=vmem,
        cost_estimate=cost,
    )(x_pad, blob)

    # Glue: slice the packed lane-dense slab and apply PyTorch's (-1, dim, 1).
    y1 = y[:B, :outsigma].reshape(-1, outsigma, 1)
    y2 = y[:B, outsigma:outsigma + n_stock].reshape(-1, n_stock, 1)
    return y1, y2


def init_params(key, n_feature, n_stock, amb="SOC_full"):
    """Deterministic synthetic init with the same shapes as the PyTorch module
    (weights kept transposed to (in, out) for the kernel)."""
    if amb == "SOC_full":
        outsigma = n_stock
    elif amb == "SOC30":
        outsigma = n_stock // 2
    elif amb == "SOC15":
        outsigma = n_stock // 4
    else:
        raise ValueError(amb)

    hidden = 10
    ks = jax.random.split(key, 8)

    def lin(kw, kb, fan_in, fan_out):
        bound = 1.0 / jnp.sqrt(jnp.float32(fan_in))
        w = jax.random.uniform(kw, (fan_in, fan_out), jnp.float32, -bound, bound)
        b = jax.random.uniform(kb, (1, fan_out), jnp.float32, -bound, bound)
        return w, b

    w11, b11 = lin(ks[0], ks[1], n_feature, hidden)
    w12, b12 = lin(ks[2], ks[3], hidden, outsigma)
    w21, b21 = lin(ks[4], ks[5], n_feature, hidden)
    w22, b22 = lin(ks[6], ks[7], hidden, n_stock)
    return (w11, b11, w12, b12, w21, b21, w22, b22), outsigma


def _reference_forward(x, params):
    w11, b11, w12, b12, w21, b21, w22, b22 = params
    hp = jax.lax.Precision.HIGHEST
    h1 = jnp.maximum(jnp.dot(x, w11, precision=hp) + b11, 0.0)
    y1 = jnp.dot(h1, w12, precision=hp) + b12
    h2 = jnp.maximum(jnp.dot(x, w21, precision=hp) + b21, 0.0)
    y2 = jnp.dot(h2, w22, precision=hp) + b22
    return y1[..., None], y2[..., None]


if __name__ == "__main__":
    # Small shapes consistent with the module: batch=8, 32 features,
    # 16 stocks, full SOC ambiguity set (outsigma == n_stock).
    batch, n_feature, n_stock = 8, 32, 16
    key = jax.random.PRNGKey(0)
    kx, kp = jax.random.split(key)

    x = jax.random.normal(kx, (batch, n_feature), dtype=jnp.float32)
    params, outsigma = init_params(kp, n_feature, n_stock, amb="SOC_full")

    blob, dims = pack_params(params, n_feature)   # one-time fused-layout packing
    y1, y2 = regression_layer_forward(x, blob, dims)
    jax.block_until_ready((y1, y2))

    # Sanity check against a pure-JAX (HIGHEST-precision) reference.
    r1, r2 = _reference_forward(x, params)
    assert y1.shape == (batch, outsigma, 1), y1.shape
    assert y2.shape == (batch, n_stock, 1), y2.shape
    assert jnp.allclose(y1, r1, atol=1e-5, rtol=1e-5)
    assert jnp.allclose(y2, r2, atol=1e-5, rtol=1e-5)

    print("KERNEL_OK")
</pallas_src>

<mosaic_0001>
module attributes {stable_mosaic.version = 11 : i64} {
  func.func @kernel(%arg0: memref<8x32xf32, #tpu.memory_space<vmem>>, %arg1: memref<176x128xf32, #tpu.memory_space<vmem>>, %arg2: memref<8x128xf32, #tpu.memory_space<vmem>>) attributes {dimension_semantics = [], scalar_prefetch = 0 : i64, scratch_operands = 0 : i64, tpu.core_type = #tpu.core_type<tc>} {
    %c0 = arith.constant 0 : index
    %c0_0 = arith.constant 0 : index
    %0 = vector.load %arg0[%c0, %c0_0] : memref<8x32xf32, #tpu.memory_space<vmem>>, vector<8x32xf32>
    %c0_1 = arith.constant 0 : index
    %c0_2 = arith.constant 0 : index
    %1 = vector.load %arg1[%c0_1, %c0_2] : memref<176x128xf32, #tpu.memory_space<vmem>>, vector<32x128xf32>
    %c32 = arith.constant 32 : index
    %c0_3 = arith.constant 0 : index
    %2 = vector.load %arg1[%c32, %c0_3] : memref<176x128xf32, #tpu.memory_space<vmem>>, vector<1x128xf32>
    %c40 = arith.constant 40 : index
    %c0_4 = arith.constant 0 : index
    %3 = vector.load %arg1[%c40, %c0_4] : memref<176x128xf32, #tpu.memory_space<vmem>>, vector<128x128xf32>
    %c168 = arith.constant 168 : index
    %c0_5 = arith.constant 0 : index
    %4 = vector.load %arg1[%c168, %c0_5] : memref<176x128xf32, #tpu.memory_space<vmem>>, vector<1x128xf32>
    %cst = arith.constant dense<0.000000e+00> : vector<8x128xf32>
    %5 = tpu.matmul %0, %1, %cst {dimension_numbers = #tpu.dot_dimension_numbers<[1], [0], [0], [1], [0, 0, 1, 1], [], []>} : vector<8x32xf32>, vector<32x128xf32>, vector<8x128xf32> -> vector<8x128xf32>
    %6 = vector.broadcast %2 : vector<1x128xf32> to vector<8x128xf32>
    %7 = arith.addf %5, %6 : vector<8x128xf32>
    %cst_6 = arith.constant 0.000000e+00 : f32
    %8 = vector.broadcast %cst_6 : f32 to vector<8x128xf32>
    %9 = arith.maximumf %7, %8 : vector<8x128xf32>
    %cst_7 = arith.constant dense<0.000000e+00> : vector<8x128xf32>
    %10 = tpu.matmul %9, %3, %cst_7 {dimension_numbers = #tpu.dot_dimension_numbers<[1], [0], [0], [1], [0, 0, 1, 1], [], []>} : vector<8x128xf32>, vector<128x128xf32>, vector<8x128xf32> -> vector<8x128xf32>
    %11 = vector.broadcast %4 : vector<1x128xf32> to vector<8x128xf32>
    %12 = arith.addf %10, %11 : vector<8x128xf32>
    %c0_8 = arith.constant 0 : index
    %c0_9 = arith.constant 0 : index
    %13 = vector.load %arg2[%c0_8, %c0_9] : memref<8x128xf32, #tpu.memory_space<vmem>>, vector<8x128xf32>
    tpu.vector_store %arg2[%c0_8, %c0_9], %12 {strides = array<i32>} : memref<8x128xf32, #tpu.memory_space<vmem>>, vector<8x128xf32>,
    return
  }
}

</mosaic_0001>

<bundles_post_ra>
// kernel: tpu_custom_call.1
= control target key start
LH: loop header
LB: loop body
LE: loop exit
PB: predicated region body
PF: predicated region fallthrough
CT: control target
= control target key end

     0   :  { %7 = vsyncpa [#allocation3], 0  ;;  %s246_s0 = inlined_call_operand.hbm [shape: f32[8,32], index: 0, kind: input, shape index: {}]   ;;  %s247_s1 = inlined_call_operand.hbm [shape: f32[176,128], index: 1, kind: input, shape index: {}]   ;;  %s248_s2 = inlined_call_operand.hbm [shape: f32[8,128], index: 2, kind: output, shape index: {}]  }
   0x1   :  { %8 = vsyncpa [#allocation6], 0 }
   0x2   :  { %9 = vsyncpa [#allocation4], 0  ;;  %s15_s11 = sshll.u32 %s246_s0, 4  ;;  %s217_s12 = smov [#allocation2]   ;;  %s16_s11 = int_to_ptr.hbm [resolvable:$true] %s15_s11 }
   0x3   :  { %s17_s13 = sshll.u32 %s217_s12, 4  ;;  %s25_s16 = sshll.u32 %s247_s1, 4  ;;  %s18_s13 = int_to_ptr.vmem [resolvable:$true] %s17_s13  ;;  %s26_s16 = int_to_ptr.hbm [resolvable:$true] %s25_s16 }
   0x4   :  { %20 = dma.hbm_to_vmem [thread:$0]  %s16_s11, 128, %s18_s13, [#allocation3]  }
   0x5   :  { %s218_s17 = smov [#allocation5]   ;;  %s219_s19 = smov 128  }
   0x6   :  { %s27_s18 = sshll.u32 %s218_s17, 4  ;;  %s220_s20 = smov 8   ;;  %s28_s18 = int_to_ptr.vmem [resolvable:$true] %s27_s18 }
   0x7   :  { %33 = dma.hbm_to_vmem [thread:$0]  %s26_s16, 2816, %s28_s18, [#allocation6], %s219_s19, %s219_s19, %s220_s20  }
   0x8   :  { %211 = dma.done.wait [#allocation3], 128  }
   0x9   :  { %212 = vsyncadd [#allocation3], 4294967168 }
   0xa   :  { %213 = dma.done.wait [#allocation6], 2816  }
   0xb   :  { %214 = vsyncadd [#allocation6], 4294964480  ;;  %v46_v0 = vld [vmem:[#allocation5 + $0x18] sm:$0xff]  ;;  %v45_v1 = vld [vmem:[#allocation5 + $0x10] sm:$0xff]  ;;  %vm66_vm0 = vcmask 261120   ;;  %s221_s0 = smov [#allocation7]  }
   0xc   :  { %82 = vmatpush.msra.mxu0 %v46_v0  ;;  %v63_v2 = vld [vmem:[#allocation5 + $0xa0] sm:$0xff]  ;;  %v44_v3 = vld [vmem:[#allocation5 + $0x8] sm:$0xff]  ;;  %v62_v4 = vld [vmem:[#allocation5 + $0x98] sm:$0xff]  ;;  %s118_s1 = sshll.u32 %s221_s0, 4  ;;  %s120_s23 = sshll.u32 %s248_s2, 4  ;;  %s119_s1 = int_to_ptr.vmem [resolvable:$true] %s118_s1  ;;  %s121_s23 = int_to_ptr.hbm [resolvable:$true] %s120_s23 }
   0xd   :  { %92 = vmatpush.msra.mxu1 %v63_v2  ;;  %v61_v5 = vld [vmem:[#allocation5 + $0x90] sm:$0xff]  ;;  %v43_v6 = vld [vmem:[#allocation5] sm:$0xff]  ;;  %v42_v7 = vld [vmem:[#allocation2] sm:$0xff] }
   0xe   :  { %83 = vmatpush.msra.mxu0 %v45_v1  ;;  %v60_v8 = vld [vmem:[#allocation5 + $0x88] sm:$0xff]  ;;  %v59_v9 = vld [vmem:[#allocation5 + $0x80] sm:$0xff]  ;;  %v58_v10 = vld [vmem:[#allocation5 + $0x78] sm:$0xff] }
   0xf   :  { %93 = vmatpush.msra.mxu1 %v62_v4  ;;  %v57_v11 = vld [vmem:[#allocation5 + $0x70] sm:$0xff]  ;;  %v56_v12 = vld [vmem:[#allocation5 + $0x68] sm:$0xff]  ;;  %v55_v13 = vld [vmem:[#allocation5 + $0x60] sm:$0xff] }
  0x10   :  { %84 = vmatpush.msra.mxu0 %v44_v3  ;;  %v54_v14 = vld [vmem:[#allocation5 + $0x58] sm:$0xff]  ;;  %v53_v15 = vld [vmem:[#allocation5 + $0x50] sm:$0xff]  ;;  %v52_v16 = vld [vmem:[#allocation5 + $0x48] sm:$0xff] }
  0x11   :  { %94 = vmatpush.msra.mxu1 %v61_v5  ;;  %v51_v17 = vld [vmem:[#allocation5 + $0x40] sm:$0xff]  ;;  %v50_v18 = vld [vmem:[#allocation5 + $0x38] sm:$0xff]  ;;  %v49_v19 = vld [vmem:[#allocation5 + $0x30] sm:$0xff] }
  0x12   :  { %85 = vmatpush.msra.mxu0 %v43_v6  ;;  %v48_v20 = vld [vmem:[#allocation5 + $0x28] sm:$0xff]  ;;  %v137_v21 = vld [vmem:[#allocation5 + $0x20] ss:$0 sm:$0xff] }
  0x13   :  { %131 = vmatmul.msk.f32.vlgmr.msra.gmra.mxu0 %vm66_vm0, %v42_v7  ;;  %95 = vmatpush.msra.mxu1 %v60_v8  ;;  %v138_v25 = vld [vmem:[#allocation5 + $0xa8] ss:$0 sm:$0xff] }
  0x15   :  { %96 = vmatpush.msra.mxu1 %v59_v9 }
  0x17   :  { %97 = vmatpush.msra.mxu1 %v58_v10 }
  0x19   :  { %98 = vmatpush.msra.mxu1 %v57_v11 }
  0x1b   :  { %99 = vmatpush.msra.mxu1 %v56_v12 }
  0x1d   :  { %100 = vmatpush.msra.mxu1 %v55_v13 }
  0x1f   :  { %101 = vmatpush.msra.mxu1 %v54_v14 }
  0x21   :  { %102 = vmatpush.msra.mxu1 %v53_v15 }
  0x23   :  { %103 = vmatpush.msra.mxu1 %v52_v16 }
  0x25   :  { %104 = vmatpush.msra.mxu1 %v51_v17 }
  0x27   :  { %105 = vmatpush.msra.mxu1 %v50_v18 }
  0x29   :  { %106 = vmatpush.msra.mxu1 %v49_v19 }
  0x2b   :  { %107 = vmatpush.msra.mxu1 %v48_v20 }
  0x90   :  { %v87_v22 = vpop.f32.mrf.mxu0 }
  0x91   :  { %v88_v23 = vadd.f32 %v137_v21, %v87_v22 }
  0x93   :  { %v90_v24 = vmax.f32 %v88_v23, 0.0 }
  0x95   :  { %108 = vmatmul.f32.vlgmr.msra.gmra.mxu1 %v90_v24 }
 0x112   :  { %v109_v26 = vpop.f32.mrf.mxu1 }
 0x113   :  { %v110_v27 = vadd.f32 %v138_v25, %v109_v26 }
 0x115   :  { %112 = vst [vmem:[#allocation7] sm:$0xff] %v110_v27 }
 0x116   :  { %123 = dma.vmem_to_hbm [thread:$0]  %s119_s1, 128, %s121_s23, [#allocation4]  }
 0x117   :  { %215 = dma.done.wait [#allocation4], 128  }
 0x118   :  { %216 = vsyncadd [#allocation4], 4294967168 }
 0x119   :  { %128 = vsyncpa [#allocation3], 1 }
 0x11a   :  { %129 = vsyncpa [#allocation6], 1 }
 0x11b   :  { %130 = vsyncpa [#allocation4], 1 }

</bundles_post_ra>
